<compile_context>
chip_gen: v7x
topology: tpu7x:2x2x1
jax: 0.10.0
libtpu: 0.0.40
codegen_flags: <defaults>
</compile_context>

<pallas_src>
import functools
import math

import jax
import jax.numpy as jnp
from jax.experimental import pallas as pl
from jax.experimental.pallas import tpu as pltpu


_LANES = 128
_SUBLANES = 8


def _round_up(a: int, b: int) -> int:
    return (a + b - 1) // b * b


def _cdiv(a: int, b: int) -> int:
    return -(-a // b)


def _int_pow(x, n: int):
    """x ** n for a non-negative Python-int n, via repeated squaring (VALU only)."""
    if n == 0:
        return jnp.ones_like(x)
    result = None
    base = x
    while n > 0:
        if n & 1:
            result = base if result is None else result * base
        n >>= 1
        if n:
            base = base * base
    return result


# -----------------------------------------------------------------------------
# Shared per-element loss math (pure jnp: used both inside the Pallas kernel and
# for the small-input / ragged-tail pure-JAX paths).
# -----------------------------------------------------------------------------
def _asl_loss_terms(x, y, *, gamma_neg, gamma_pos, clip, eps, binary_targets):
    x = x.astype(jnp.float32)
    y = y.astype(jnp.float32)

    # sigmoid via tanh: single EUP transcendental, no divide, full f32 precision.
    xs_pos = 0.5 * (jnp.tanh(0.5 * x) + 1.0)
    xs_neg = 1.0 - xs_pos
    if clip is not None and clip > 0:
        xs_neg = jnp.minimum(xs_neg + clip, 1.0)

    use_focal = (gamma_neg > 0) or (gamma_pos > 0)
    int_gammas = (float(gamma_pos).is_integer() and float(gamma_neg).is_integer()
                  and 0 <= gamma_pos <= 32 and 0 <= gamma_neg <= 32)

    if binary_targets:
        # Exact for hard 0/1 targets: one log instead of two, per-class weight
        # picked by select instead of blended exponents.
        is_pos = y > 0.5
        pt = jnp.where(is_pos, xs_pos, xs_neg)
        loss = jnp.log(jnp.maximum(pt, eps))
        if use_focal:
            one_minus_pt = 1.0 - pt
            if int_gammas:
                w = jnp.where(is_pos,
                              _int_pow(one_minus_pt, int(gamma_pos)),
                              _int_pow(one_minus_pt, int(gamma_neg)))
            else:
                gamma = jnp.where(is_pos, gamma_pos, gamma_neg)
                w = jnp.exp(gamma * jnp.log(jnp.maximum(one_minus_pt, 1e-30)))
            loss = loss * w
        return loss

    # General (soft-label) path: op-for-op with the PyTorch module.
    los_pos = y * jnp.log(jnp.maximum(xs_pos, eps))
    los_neg = (1.0 - y) * jnp.log(jnp.maximum(xs_neg, eps))
    loss = los_pos + los_neg
    if use_focal:
        pt = xs_pos * y + xs_neg * (1.0 - y)
        gamma = gamma_pos * y + gamma_neg * (1.0 - y)
        one_minus_pt = jnp.maximum(1.0 - pt, 1e-30)
        loss = loss * jnp.exp(gamma * jnp.log(one_minus_pt))
    return loss


# -----------------------------------------------------------------------------
# Pallas kernel: fused elementwise loss + per-tile partial reduction
# -----------------------------------------------------------------------------
def _asl_kernel(x_ref, y_ref, o_ref, *, gamma_neg, gamma_pos, clip, eps,
                binary_targets, tile_rows, valid_rows_last, mask_last_tile):
    # x_ref, y_ref: (tile_rows, 128) blocks in their native dtype.
    # o_ref:        (8, 128) f32 — this tile's partial sum folded to one vreg.
    loss = _asl_loss_terms(
        x_ref[...], y_ref[...],
        gamma_neg=gamma_neg, gamma_pos=gamma_pos, clip=clip, eps=eps,
        binary_targets=binary_targets)

    def fold(v):
        # Reduce over the leading axis only: pure full-vreg adds, no XLU work.
        return jnp.sum(v.reshape(tile_rows // _SUBLANES, _SUBLANES, _LANES),
                       axis=0)

    if mask_last_tile:
        is_last = pl.program_id(0) == pl.num_programs(0) - 1

        @pl.when(is_last)
        def _():
            # Rows >= valid_rows_last were read out of bounds (garbage); a
            # select (not a multiply) drops them even if they are NaN/Inf.
            row = jax.lax.broadcasted_iota(jnp.int32, (tile_rows, _LANES), 0)
            o_ref[...] = fold(jnp.where(row < valid_rows_last, loss, 0.0))

        @pl.when(jnp.logical_not(is_last))
        def _():
            o_ref[...] = fold(loss)
    else:
        o_ref[...] = fold(loss)


# -----------------------------------------------------------------------------
# Wrapper
# -----------------------------------------------------------------------------
def asymmetric_loss(x, y, *, gamma_neg=4.0, gamma_pos=1.0, clip=0.05, eps=1e-8,
                    binary_targets=True, max_tile_rows=4096,
                    min_pallas_elems=65536):
    """Fused Pallas implementation of AsymmetricLoss.forward. Returns a scalar.

    binary_targets=True assumes y contains hard 0/1 labels (the module's
    documented use: "multi-label binarized vector") and enables the single-log
    / integer-power fast path; set False for soft labels (exact op-for-op).
    """
    if x.shape != y.shape:
        raise ValueError(f"x/y shape mismatch: {x.shape} vs {y.shape}")

    total = int(math.prod(x.shape)) if x.shape else 1
    kw = dict(gamma_neg=float(gamma_neg), gamma_pos=float(gamma_pos),
              clip=clip, eps=float(eps), binary_targets=binary_targets)

    rows = total // _LANES
    # Small-input fast path: pallas_call launch/pipeline overhead dominates
    # below ~64K elements; XLA fuses the elementwise+reduce fine at that size.
    if total < int(min_pallas_elems) or rows < _SUBLANES:
        return -jnp.mean(_asl_loss_terms(x, y, **kw))

    xf = jnp.reshape(x, (-1,))
    yf = jnp.reshape(y, (-1,))
    rem = total - rows * _LANES

    tail_sum = jnp.float32(0.0)
    if rem:
        # < 128-element ragged tail: tiny pure-JAX epilogue (no full-array pad).
        # The prefix slice below is the only extra copy and occurs only when
        # total is not 128-divisible.
        tail_sum = jnp.sum(_asl_loss_terms(xf[rows * _LANES:],
                                           yf[rows * _LANES:], **kw))
        xf = xf[: rows * _LANES]
        yf = yf[: rows * _LANES]

    # Zero-copy lane-dense (rows, 128) view, streamed in the native dtype.
    x2 = xf.reshape(rows, _LANES)
    y2 = yf.reshape(rows, _LANES)

    # Tile sizing: large tiles to amortize per-grid-step overhead, capped so
    # (a) the block never exceeds the array rows and (b) num_tiles >= 2 when
    # possible (keeps both v7x TensorCores busy on the 'parallel' axis).
    mtr = max(_SUBLANES, (int(max_tile_rows) // _SUBLANES) * _SUBLANES)
    tile_rows = min(mtr, (rows // _SUBLANES) * _SUBLANES)
    if rows >= 2 * _SUBLANES:
        tile_rows = min(tile_rows, _round_up(_cdiv(rows, 2), _SUBLANES))
    num_tiles = _cdiv(rows, tile_rows)
    valid_rows_last = rows - (num_tiles - 1) * tile_rows
    mask_last_tile = valid_rows_last != tile_rows

    kernel = functools.partial(
        _asl_kernel, tile_rows=tile_rows, valid_rows_last=valid_rows_last,
        mask_last_tile=mask_last_tile, **kw)

    partials = pl.pallas_call(
        kernel,
        out_shape=jax.ShapeDtypeStruct((num_tiles * _SUBLANES, _LANES),
                                       jnp.float32),
        grid_spec=pltpu.PrefetchScalarGridSpec(
            num_scalar_prefetch=0,
            grid=(num_tiles,),
            in_specs=[
                pl.BlockSpec((tile_rows, _LANES), lambda i: (i, 0)),
                pl.BlockSpec((tile_rows, _LANES), lambda i: (i, 0)),
            ],
            out_specs=pl.BlockSpec((_SUBLANES, _LANES), lambda i: (i, 0)),
        ),
        compiler_params=pltpu.CompilerParams(
            dimension_semantics=("parallel",),
            vmem_limit_bytes=32 * 1024 * 1024),
    )(x2, y2)

    # Trivial final combine over a few KiB of partial sums.
    return -(jnp.sum(partials) + tail_sum) / total


class AsymmetricLossPallas:
    """Forward-pass equivalent of the PyTorch AsymmetricLoss module."""

    def __init__(self, gamma_neg=4, gamma_pos=1, clip=0.05, eps=1e-8,
                 disable_torch_grad_focal_loss=True, binary_targets=True,
                 max_tile_rows=4096, min_pallas_elems=65536):
        # TODO(synk): disable_torch_grad_focal_loss only alters PyTorch
        # autograd; the forward value is identical, so it is a no-op here.
        self.gamma_neg = float(gamma_neg)
        self.gamma_pos = float(gamma_pos)
        self.clip = clip
        self.eps = float(eps)
        self.binary_targets = binary_targets
        self.max_tile_rows = max_tile_rows
        self.min_pallas_elems = min_pallas_elems

    def __call__(self, x, y):
        return asymmetric_loss(
            x, y, gamma_neg=self.gamma_neg, gamma_pos=self.gamma_pos,
            clip=self.clip, eps=self.eps, binary_targets=self.binary_targets,
            max_tile_rows=self.max_tile_rows,
            min_pallas_elems=self.min_pallas_elems)


# -----------------------------------------------------------------------------
# Pure-JAX reference (mirrors the PyTorch forward op-for-op)
# -----------------------------------------------------------------------------
def _asymmetric_loss_ref(x, y, gamma_neg=4.0, gamma_pos=1.0, clip=0.05,
                         eps=1e-8):
    xs = jax.nn.sigmoid(x)
    xs_pos = xs
    xs_neg = 1.0 - xs
    if clip is not None and clip > 0:
        xs_neg = jnp.minimum(xs_neg + clip, 1.0)
    los_pos = y * jnp.log(jnp.maximum(xs_pos, eps))
    los_neg = (1.0 - y) * jnp.log(jnp.maximum(xs_neg, eps))
    loss = los_pos + los_neg
    if gamma_neg > 0 or gamma_pos > 0:
        pt = xs_pos * y + xs_neg * (1.0 - y)
        gamma = gamma_pos * y + gamma_neg * (1.0 - y)
        loss = loss * jnp.power(1.0 - pt, gamma)
    return -jnp.mean(loss)


if __name__ == "__main__":
    key = jax.random.PRNGKey(0)
    ks = jax.random.split(key, 12)

    loss_fn = AsymmetricLossPallas()

    def check(out, ref):
        assert out.shape == ()
        assert jnp.isfinite(out)
        assert jnp.allclose(out, ref, atol=2e-5, rtol=2e-4), (out, ref)

    # 1) Small COCO-like head (B=8, C=80): default call -> small-input fast path.
    x1 = 2.0 * jax.random.normal(ks[0], (8, 80), jnp.float32)
    y1 = (jax.random.uniform(ks[1], (8, 80)) < 0.1).astype(jnp.float32)
    out1 = loss_fn(x1, y1)
    jax.block_until_ready(out1)
    check(out1, _asymmetric_loss_ref(x1, y1))

    # 2) Forced Pallas path, ragged rows (rows=10 -> 2 tiles, masked last tile).
    x2 = 2.0 * jax.random.normal(ks[2], (16, 80), jnp.float32)
    y2 = (jax.random.uniform(ks[3], (16, 80)) < 0.1).astype(jnp.float32)
    out2 = asymmetric_loss(x2, y2, min_pallas_elems=0)
    jax.block_until_ready(out2)
    check(out2, _asymmetric_loss_ref(x2, y2))

    # 3) Forced Pallas, fully aligned, bf16 inputs (native-dtype streaming).
    x3 = jax.random.normal(ks[4], (64, 128), jnp.float32).astype(jnp.bfloat16)
    y3 = (jax.random.uniform(ks[5], (64, 128)) < 0.25).astype(jnp.bfloat16)
    out3 = asymmetric_loss(x3, y3, min_pallas_elems=0)
    jax.block_until_ready(out3)
    check(out3, _asymmetric_loss_ref(x3.astype(jnp.float32),
                                     y3.astype(jnp.float32)))

    # 4) Forced multi-tile grid + non-128-divisible total (32-element epilogue).
    x4 = jax.random.normal(ks[6], (32, 257), jnp.float32)
    y4 = (jax.random.uniform(ks[7], (32, 257)) < 0.5).astype(jnp.float32)
    out4 = asymmetric_loss(x4, y4, min_pallas_elems=0, max_tile_rows=16)
    jax.block_until_ready(out4)
    check(out4, _asymmetric_loss_ref(x4, y4))

    # 5) Soft labels: general fallback path (binary_targets=False), forced kernel.
    x5 = jax.random.normal(ks[8], (16, 128), jnp.float32)
    y5 = jax.random.uniform(ks[9], (16, 128))
    out5 = asymmetric_loss(x5, y5, binary_targets=False, min_pallas_elems=0)
    jax.block_until_ready(out5)
    check(out5, _asymmetric_loss_ref(x5, y5))

    # 6) Large enough to take the kernel path with default settings (2 tiles).
    x6 = jax.random.normal(ks[10], (512, 160), jnp.float32)
    y6 = (jax.random.uniform(ks[11], (512, 160)) < 0.2).astype(jnp.float32)
    out6 = loss_fn(x6, y6)
    jax.block_until_ready(out6)
    check(out6, _asymmetric_loss_ref(x6, y6))

    print("KERNEL_OK")
</pallas_src>

<mosaic_0001>
module attributes {stable_mosaic.version = 11 : i64} {
  func.func @_asl_kernel(%arg0: i32, %arg1: memref<8x128xf32, #tpu.memory_space<vmem>>, %arg2: memref<8x128xf32, #tpu.memory_space<vmem>>, %arg3: memref<8x128xf32, #tpu.memory_space<vmem>>) attributes {dimension_semantics = [#tpu.dimension_semantics<parallel>], iteration_bounds = array<i64: 2>, scalar_prefetch = 0 : i64, scratch_operands = 0 : i64, tpu.core_type = #tpu.core_type<tc>, window_params = [{transform_indices = @transform_0, window_bounds = array<i64: 8, 128>}, {transform_indices = @transform_1, window_bounds = array<i64: 8, 128>}, {transform_indices = @transform_2, window_bounds = array<i64: 8, 128>}]} {
    %c0 = arith.constant 0 : index
    %c0_0 = arith.constant 0 : index
    %0 = vector.load %arg1[%c0, %c0_0] : memref<8x128xf32, #tpu.memory_space<vmem>>, vector<8x128xf32>
    %c0_1 = arith.constant 0 : index
    %c0_2 = arith.constant 0 : index
    %1 = vector.load %arg2[%c0_1, %c0_2] : memref<8x128xf32, #tpu.memory_space<vmem>>, vector<8x128xf32>
    %cst = arith.constant 5.000000e-01 : f32
    %2 = vector.broadcast %cst : f32 to vector<8x128xf32>
    %3 = arith.mulf %2, %0 : vector<8x128xf32>
    %4 = math.tanh %3 : vector<8x128xf32>
    %cst_3 = arith.constant 1.000000e+00 : f32
    %5 = vector.broadcast %cst_3 : f32 to vector<8x128xf32>
    %6 = arith.addf %4, %5 : vector<8x128xf32>
    %cst_4 = arith.constant 5.000000e-01 : f32
    %7 = vector.broadcast %cst_4 : f32 to vector<8x128xf32>
    %8 = arith.mulf %7, %6 : vector<8x128xf32>
    %cst_5 = arith.constant 1.000000e+00 : f32
    %9 = vector.broadcast %cst_5 : f32 to vector<8x128xf32>
    %10 = arith.subf %9, %8 : vector<8x128xf32>
    %cst_6 = arith.constant 5.000000e-02 : f32
    %11 = vector.broadcast %cst_6 : f32 to vector<8x128xf32>
    %12 = arith.addf %10, %11 : vector<8x128xf32>
    %cst_7 = arith.constant 1.000000e+00 : f32
    %13 = vector.broadcast %cst_7 : f32 to vector<8x128xf32>
    %14 = arith.minimumf %12, %13 : vector<8x128xf32>
    %cst_8 = arith.constant 5.000000e-01 : f32
    %15 = vector.broadcast %cst_8 : f32 to vector<8x128xf32>
    %16 = arith.cmpf ogt, %1, %15 : vector<8x128xf32>
    %17 = arith.select %16, %8, %14 : vector<8x128xi1>, vector<8x128xf32>
    %cst_9 = arith.constant 9.99999993E-9 : f32
    %18 = vector.broadcast %cst_9 : f32 to vector<8x128xf32>
    %19 = arith.maximumf %17, %18 : vector<8x128xf32>
    %20 = math.log %19 : vector<8x128xf32>
    %cst_10 = arith.constant 1.000000e+00 : f32
    %21 = vector.broadcast %cst_10 : f32 to vector<8x128xf32>
    %22 = arith.subf %21, %17 : vector<8x128xf32>
    %23 = arith.mulf %22, %22 : vector<8x128xf32>
    %24 = arith.mulf %23, %23 : vector<8x128xf32>
    %25 = arith.select %16, %22, %24 : vector<8x128xi1>, vector<8x128xf32>
    %26 = arith.mulf %20, %25 : vector<8x128xf32>
    %c1_i32 = arith.constant 1 : i32
    %27 = arith.cmpi eq, %arg0, %c1_i32 : i32
    %28 = arith.extui %27 : i1 to i32
    %c0_i32 = arith.constant 0 : i32
    %29 = arith.cmpi ne, %28, %c0_i32 : i32
    scf.if %29 {
      %33 = tpu.iota {dimensions = array<i32: 0>} : vector<8x128xi32>
      %c2_i32 = arith.constant 2 : i32
      %34 = vector.broadcast %c2_i32 : i32 to vector<8x128xi32>
      %35 = arith.cmpi slt, %33, %34 : vector<8x128xi32>
      %cst_12 = arith.constant 0.000000e+00 : f32
      %36 = vector.broadcast %cst_12 : f32 to vector<8x128xf32>
      %37 = arith.select %35, %26, %36 : vector<8x128xi1>, vector<8x128xf32>
      %38 = vector.shape_cast %37 : vector<8x128xf32> to vector<1x8x128xf32>
      %cst_13 = arith.constant dense<0.000000e+00> : vector<8x128xf32>
      %39 = vector.multi_reduction <add>, %38, %cst_13 [0] : vector<1x8x128xf32> to vector<8x128xf32>
      %c0_14 = arith.constant 0 : index
      %c0_15 = arith.constant 0 : index
      %40 = vector.load %arg3[%c0_14, %c0_15] : memref<8x128xf32, #tpu.memory_space<vmem>>, vector<8x128xf32>
      tpu.vector_store %arg3[%c0_14, %c0_15], %39 {strides = array<i32>} : memref<8x128xf32, #tpu.memory_space<vmem>>, vector<8x128xf32>,
    } else {
    }
    %true = arith.constant true
    %30 = arith.xori %27, %true : i1
    %31 = arith.extui %30 : i1 to i32
    %c0_i32_11 = arith.constant 0 : i32
    %32 = arith.cmpi ne, %31, %c0_i32_11 : i32
    scf.if %32 {
      %33 = vector.shape_cast %26 : vector<8x128xf32> to vector<1x8x128xf32>
      %cst_12 = arith.constant dense<0.000000e+00> : vector<8x128xf32>
      %34 = vector.multi_reduction <add>, %33, %cst_12 [0] : vector<1x8x128xf32> to vector<8x128xf32>
      %c0_13 = arith.constant 0 : index
      %c0_14 = arith.constant 0 : index
      %35 = vector.load %arg3[%c0_13, %c0_14] : memref<8x128xf32, #tpu.memory_space<vmem>>, vector<8x128xf32>
      tpu.vector_store %arg3[%c0_13, %c0_14], %34 {strides = array<i32>} : memref<8x128xf32, #tpu.memory_space<vmem>>, vector<8x128xf32>,
    } else {
    }
    return
  }
  func.func @transform_0(%arg0: i32) -> (i32, i32) {
    %c0_i32 = arith.constant 0 : i32
    %c0_i32_0 = arith.constant 0 : i32
    return %arg0, %c0_i32 : i32, i32
  }
  func.func @transform_1(%arg0: i32) -> (i32, i32) {
    %c0_i32 = arith.constant 0 : i32
    %c0_i32_0 = arith.constant 0 : i32
    return %arg0, %c0_i32 : i32, i32
  }
  func.func @transform_2(%arg0: i32) -> (i32, i32) {
    %c0_i32 = arith.constant 0 : i32
    %c0_i32_0 = arith.constant 0 : i32
    return %arg0, %c0_i32 : i32, i32
  }
}

</mosaic_0001>

<bundles_post_ra>
// kernel: tpu_custom_call.1
= control target key start
LH: loop header
LB: loop body
LE: loop exit
PB: predicated region body
PF: predicated region fallthrough
CT: control target
= control target key end

     0   :  { %7 = vsyncpa [#allocation3], 0  ;;  %s768_s0 = inlined_call_operand.hbm [shape: f32[10,128], index: 0, kind: input, shape index: {}]   ;;  %s769_s1 = inlined_call_operand.hbm [shape: f32[10,128], index: 1, kind: input, shape index: {}]   ;;  %s770_s2 = inlined_call_operand.hbm [shape: f32[16,128], index: 2, kind: output, shape index: {}]  }
   0x1   :  { %9 = vsyncpa [#allocation3 + $0x1], 0 }
   0x2   :  { %10 = vsyncpa [#allocation6], 0 }
   0x3   :  { %12 = vsyncpa [#allocation6 + $0x1], 0 }
   0x4   :  { %13 = vsyncpa [#allocation4], 0 }
   0x5   :  { %15 = vsyncpa [#allocation4 + $0x1], 0  ;;  %s560_s9 = smov 0   ;;  %s562_s10 = smov 0  }
   0x6   :  { %s564_s11 = smov 0   ;;  %s566_s12 = smov 0  }
   0x7 LB: > { %s581_s13 = sadd.s32 4294967295, %s540_s12   ;;  %s338_s14 = sadd.s32 4294967294, %s540_s12   ;;  %s540_s12 = sphi %s566_s12, %s791_s12   ;;  %s536_s11 = sphi %s564_s11, %s790_s11   ;;  %s532_s10 = sphi %s562_s10, %s789_s10   ;;  %s528_s9 = sphi %s560_s9, %s788_s9  }
   0x8   : > { %s585_s15 = sadd.s32 1, %s540_s12   ;;  %s28_s16 = sadd.s32 1, %s536_s11 }
   0x9   : > { %s25_s17 = ssub.s32 %s540_s12, %s585_s15  ;;  %p35_p0 = scmp.ne.s32.totalorder %s536_s11, %s532_s10 }
   0xa   : > { %p26_p1 = scmp.eq.s32.totalorder %s25_s17, 0  ;;  %p36_p2 = scmp.eq.s32.totalorder %s540_s12, 0 }
   0xb   : > { %p41_p3 = scmp.ne.s32.totalorder %s532_s10, %s528_s9  ;;  %p42_p4 = scmp.eq.s32.totalorder %s581_s13, 0 }
   0xc   : > { %s597_s18 = scalar_select %p26_p1, %s536_s11, %s28_s16  }
   0xd   : > { %p599_p5 = por %p36_p2, %p35_p0  ;;  %p603_p6 = por %p42_p4, %p41_p3 }
   0xe   : > { %p771_p7 = scmp.eq.s32.totalorder %s581_s13, 1  ;;  %p97_p8 = scmp.eq.s32.totalorder %s338_s14, 1 }
   0xf   : > { %s775_s20 = scalar_select %p603_p6, 1, 0 }
  0x10   : > { %p372_p10 = scmp.lt.s32.totalorder %s540_s12, 2  ;;  %p612_p11 = por %p771_p7, %p35_p0 }
  0x11   : > { %p616_p12 = por %p97_p8, %p41_p3  ;;  %s621_s23 = sand.u32 1, %s536_s11  }
  0x12   : > { %s776_s21 = scalar_select %p612_p11, 1, 0 }
  0x13   : > { %s777_s22 = scalar_select %p616_p12, 1, 0 }
  0x14   : > { %s342_s24 = sshll.u32 %s540_s12, 7  ;;  %s341_s25 = sshll.u32 %s621_s23, 3 }
  0x15   : > { %s630_s28 = scalar_lea.hbm %s768_s0, %s342_s24  ;;  %s121_s29 = scalar_lea.vmem [#allocation2], %s341_s25 }
  0x16   : > { %s128_s30 = sshll.u32 %s121_s29, 4  ;;  %p636_p13 = pnand %p372_p10, %p599_p5  ;;  %s640_s30 = int_to_ptr.vmem [resolvable:$true] %s128_s30 }
  0x17   : > { %s118_s4 = scalar_lea.sflag [#allocation3], %s621_s23  ;;  %s410_s5 = scalar_lea.hbm %s630_s28, 128 }
  0x18   : > { %p411_p2 = scmp.ne.s32.totalorder %s630_s28, %s410_s5  ;;  %p412_p3 = pneg %p636_p13 }
  0x19   : > { %s415_s8 = scalar_lea.hbm %s768_s0, 256  ;;  %p416_p5 = scmp.lt.u32.totalorder %s630_s28, %s768_s0 }
  0x1a   : > { %p413_p4 = pnand %p412_p3, %p411_p2  ;;  %p417_p10 = scmp.lt.u32.totalorder %s415_s8, %s410_s5 }
  0x1b   : > { %p419_p7 = scmp.lt.u32.totalorder %s410_s5, %s630_s28 }
  0x1c   : > { %p414_p8 = pneg %p413_p4  ;;  %p418_p9 = por %p417_p10, %p416_p5 }
  0x1e   : > { %p420_p0 = por %p419_p7, %p418_p9 }
  0x20   : > { %p421_p1 = pnand %p420_p0, %p414_p8 }
  0x22   : > { %424 = shalt.err (!%p421_p1)
}
  0x23   : > { %s425_s17 = scalar_lea.vmem %s640_s30, 128  ;;  %s542_s19 = smov [#allocation2]  }
  0x24   : > { %p426_p2 = scmp.ne.s32.totalorder %s640_s30, %s425_s17  ;;  %s430_s26 = sshll.u32 %s542_s19, 4  ;;  %s431_s26 = int_to_ptr.vmem [resolvable:$false] %s430_s26 }
  0x25   : > { %s432_s27 = scalar_lea.vmem %s431_s26, 256  ;;  %p433_p11 = scmp.lt.s32.totalorder %s640_s30, %s431_s26 }
  0x26   : > { %p428_p4 = pnand %p426_p2, %p412_p3  ;;  %p434_p5 = scmp.lt.s32.totalorder %s432_s27, %s425_s17 }
  0x28   : > { %p429_p12 = pneg %p428_p4  ;;  %p435_p10 = por %p434_p5, %p433_p11 }
  0x2a   : > { %p436_p7 = pnand %p435_p10, %p429_p12 }
  0x2c   : > { %439 = shalt.err (!%p436_p7)
}
  0x2d   : > { %364 = dma.hbm_to_vmem [thread:$0]  (!%p636_p13), %s630_s28, 128, %s640_s30, %s118_s4  }
  0x2e   : > { %p779_p9 = scmp.lt.s32.totalorder %s540_s12, 3  ;;  %p780_p0 = scmp.ge.s32.totalorder %s540_s12, 1 }
  0x2f   : > { %s683_s7 = scalar_lea.hbm %s769_s1, %s342_s24  ;;  %s139_s8 = scalar_lea.vmem [#allocation5], %s341_s25 }
  0x30   : > { %p674_p1 = pnand %p780_p0, %p779_p9  ;;  %s146_s14 = sshll.u32 %s139_s8, 4  ;;  %s147_s14 = int_to_ptr.vmem [resolvable:$true] %s146_s14 }
  0x31   : > { %s136_s28 = scalar_lea.sflag [#allocation6], %s621_s23  ;;  %s440_s30 = scalar_lea.hbm %s683_s7, 128 }
  0x32   : > { %s781_s29 = scalar_select %p674_p1, 1, 0 }
  0x33   : > { %p441_p11 = scmp.ne.s32.totalorder %s683_s7, %s440_s30  ;;  %s445_s24 = scalar_lea.hbm %s769_s1, 256 }
  0x34   : > { %p446_p2 = scmp.lt.u32.totalorder %s683_s7, %s769_s1  ;;  %p447_p4 = scmp.lt.u32.totalorder %s445_s24, %s440_s30 }
  0x35   : > { %p443_p12 = pnand %p441_p11, %p412_p3  ;;  %p449_p10 = scmp.lt.u32.totalorder %s440_s30, %s683_s7 }
  0x36   : > { %p448_p5 = por %p447_p4, %p446_p2 }
  0x37   : > { %p444_p8 = pneg %p443_p12 }
  0x38   : > { %p450_p7 = por %p449_p10, %p448_p5 }
  0x3a   : > { %p451_p9 = pnand %p450_p7, %p444_p8 }
  0x3c   : > { %454 = shalt.err (!%p451_p9)
}
  0x3d   : > { %s455_s23 = scalar_lea.vmem %s147_s14, 128  ;;  %s543_s25 = smov [#allocation5]  }
  0x3e   : > { %p456_p0 = scmp.ne.s32.totalorder %s147_s14, %s455_s23  ;;  %s460_s26 = sshll.u32 %s543_s25, 4  ;;  %s461_s26 = int_to_ptr.vmem [resolvable:$false] %s460_s26 }
  0x3f   : > { %s462_s27 = scalar_lea.vmem %s461_s26, 256  ;;  %p463_p6 = scmp.lt.s32.totalorder %s147_s14, %s461_s26 }
  0x40   : > { %p458_p11 = pnand %p456_p0, %p412_p3  ;;  %p464_p1 = scmp.lt.s32.totalorder %s462_s27, %s455_s23 }
  0x42   : > { %p459_p12 = pneg %p458_p11  ;;  %p465_p2 = por %p464_p1, %p463_p6 }
  0x44   : > { %p466_p4 = pnand %p465_p2, %p459_p12 }
  0x46   : > { %469 = shalt.err (!%p466_p4)
}
  0x47   : > { %367 = dma.hbm_to_vmem [thread:$0]  (!%p636_p13), %s683_s7, 128, %s147_s14, %s136_s28  }
  0x48   : > { %p782_p8 = scmp.ne.s32.totalorder %s781_s29, 0 }
  0x49   : > { %s710_s5 = sand.u32 (!%p782_p8), 1, %s532_s10   ;;  %p783_p3 = scmp.ne.s32.totalorder (!%p782_p8), %s775_s20, 0 }
  0x4a   : > { %155 = sbr.rel (%p782_p8) target bundleno = 162 (0xa2), region = 28  ;;  %s346_s6 = sshll.u32 (!%p782_p8), %s710_s5, 3 }
  0x4b   : > { %s158_s8 = scalar_lea.sflag (!%p782_p8), [#allocation3], %s710_s5  ;;  %s161_s30 = scalar_lea.vmem (!%p782_p8), [#allocation2], %s346_s6 }
  0x51   : > { %515 = dma.done.wait (%p783_p3), %s158_s8, 128  }
  0x52   : > { %517 = vsyncadd (%p783_p3), %s158_s8, 4294967168  ;;  %s167_s3 = scalar_lea.sflag [#allocation6], %s710_s5  ;;  %s170_s7 = scalar_lea.vmem [#allocation5], %s346_s6 }
  0x53   : > { %519 = dma.done.wait (%p783_p3), %s167_s3, 128  }
  0x54   : > { %521 = vsyncadd (%p783_p3), %s167_s3, 4294967168  ;;  %v196_v0 = vld [vmem:[%s161_s30] sm:$0xff]  ;;  %v197_v5 = vld [vmem:[%s170_s7] sm:$0xff]  ;;  %s195_s20 = scalar_lea.vmem [#allocation7], %s346_s6  ;;  %p349_p6 = scmp.ne.s32.totalorder %s581_s13, 1 }
  0x55   : > { %v198_v1 = vmul.f32 0.5, %v196_v0  ;;  %vm205_vm0 = vcmp.gt.f32.partialorder %v197_v5, 0.5  ;;  %v219_v18 = vlaneseq (!%p349_p6) }
  0x57   : > { %406 = vtanh.f32 %v198_v1  ;;  %v220_v19 = vshrl.u32 (!%p349_p6), %v219_v18, 7 }
  0x59   : > { %vm221_vm1 = vcmp.lt.s32.totalorder (!%p349_p6), %v220_v19, 2 }
  0x61   : > { %v407_v2 = vpop.eup %406 }
  0x62   : > { %v200_v3 = vadd.f32 1.0, %v407_v2 }
  0x64   : > { %v201_v4 = vmul.f32 0.5, %v200_v3 }
  0x66   : > { %v202_v6 = vsub.f32 1.0, %v201_v4 }
  0x68   : > { %v203_v7 = vadd.f32 0.05, %v202_v6 }
  0x6a   : > { %v204_v8 = vmin.f32 %v203_v7, 1.0 }
  0x6c   : > { %v206_v9 = vsel %vm205_vm0, %v201_v4, %v204_v8 }
  0x6d   : > { %v207_v10 = vmax.f32 %v206_v9, 1e-08  ;;  %v210_v11 = vsub.f32 1.0, %v206_v9 }
  0x6f   : > { %408 = vlog2.f32 %v207_v10  ;;  %v211_v12 = vmul.f32 %v210_v11, %v210_v11 }
  0x71   : > { %v212_v13 = vmul.f32 %v211_v12, %v211_v12 }
  0x73   : > { %v213_v15 = vsel %vm205_vm0, %v210_v11, %v212_v13 }
  0x76   : > { %218 = sbr.rel (%p349_p6) target bundleno = 128 (0x80), region = 40 }
  0x79   : > { %v409_v14 = vpop.eup %408 }
  0x7a   : > { %v209_v16 = vmul.f32 0.6931472, %v409_v14 }
  0x7c   : > { %v214_v17 = vmul.f32 %v213_v15, %v209_v16 }
  0x7e   : > { %v222_v20 = vsel %vm221_vm1, %v214_v17, 0.0 }
  0x7f   : > { %224 = vst [vmem:[%s195_s20] sm:$0xff] %v222_v20 }
  0x80 PF: > { %p784_p13 = scmp.eq.s32.totalorder %s581_s13, 1 }
  0x81   : > { %230 = vst [vmem:[%s195_s20] sm:$0xff] (!%p784_p13), %v214_v17 }
  0x82   : > { %228 = sbr.rel (%p784_p13) target bundleno = 137 (0x89), region = 44 }
  0x89 PF: > { %s352_s29 = sshll.u32 %s581_s13, 7  ;;  %s245_s16 = sshll.u32 %s195_s20, 4  ;;  %s246_s16 = int_to_ptr.vmem [resolvable:$true] %s245_s16 }
  0x8a   : > { %s730_s4 = scalar_lea.hbm %s770_s2, %s352_s29  ;;  %s232_s24 = scalar_lea.sflag [#allocation4], %s710_s5 }
  0x8b   : > { %s470_s17 = scalar_lea.vmem %s246_s16, 128  ;;  %p785_p5 = scmp.ne.s32.totalorder %s776_s21, 0 }
  0x8c   : > { %p471_p1 = scmp.ne.s32.totalorder %s246_s16, %s470_s17  ;;  %s544_s19 = smov [#allocation7]  }
  0x8d   : > { %s474_s23 = sshll.u32 %s544_s19, 4  ;;  %s475_s23 = int_to_ptr.vmem [resolvable:$false] %s474_s23 }
  0x8e   : > { %p472_p10 = pnand %p471_p1, %p785_p5  ;;  %s476_s25 = scalar_lea.vmem %s475_s23, 256 }
  0x8f   : > { %p477_p9 = scmp.lt.s32.totalorder %s246_s16, %s475_s23  ;;  %p478_p0 = scmp.lt.s32.totalorder %s476_s25, %s470_s17 }
  0x90   : > { %p473_p7 = pneg %p472_p10 }
  0x91   : > { %p479_p11 = por %p478_p0, %p477_p9 }
  0x93   : > { %p480_p12 = pnand %p479_p11, %p473_p7 }
  0x95   : > { %483 = shalt.err (!%p480_p12)
}
  0x96   : > { %s484_s13 = scalar_lea.hbm %s730_s4, 128  ;;  %s488_s5 = scalar_lea.hbm %s770_s2, 256 }
  0x97   : > { %p485_p2 = scmp.ne.s32.totalorder %s730_s4, %s484_s13  ;;  %p489_p3 = scmp.lt.u32.totalorder %s730_s4, %s770_s2 }
  0x98   : > { %p490_p6 = scmp.lt.u32.totalorder %s488_s5, %s484_s13  ;;  %p492_p1 = scmp.lt.u32.totalorder %s484_s13, %s730_s4 }
  0x99   : > { %p486_p4 = pnand %p485_p2, %p785_p5 }
  0x9a   : > { %p491_p13 = por %p490_p6, %p489_p3 }
  0x9b   : > { %p487_p8 = pneg %p486_p4 }
  0x9c   : > { %p493_p10 = por %p492_p1, %p491_p13 }
  0x9e   : > { %p494_p7 = pnand %p493_p10, %p487_p8 }
  0xa0   : > { %497 = shalt.err (!%p494_p7)
}
  0xa1   : > { %359 = dma.vmem_to_hbm [thread:$0]  (%p785_p5), %s246_s16, 128, %s730_s4, %s232_s24  }
  0xa2 PF: > { %s257_s30 = sand.u32 1, %s528_s9   ;;  %p786_p9 = scmp.ne.s32.totalorder %s777_s22, 0 }
  0xa3   : > { %p787_p0 = scmp.ge.s32.totalorder %s540_s12, 2  ;;  %s258_s3 = scalar_lea.sflag [#allocation4], %s257_s30 }
  0xa5   : > { %p369_p11 = pnand %p787_p0, %p786_p9 }
  0xa7   : > { %523 = dma.done.wait (!%p369_p11), %s258_s3, 128  }
  0xa8   : > { %525 = vsyncadd (!%p369_p11), %s258_s3, 4294967168  ;;  %p18_p12 = scmp.ge.s32.totalorder %s585_s15, 4   ;;  %s788_s9 = smov %s532_s10 }
  0xa9   : > { %s789_s10 = smov %s536_s11  ;;  %s790_s11 = smov %s597_s18 }
  0xaa   : > { %s791_s12 = smov %s585_s15  ;;  %20 = sbr.rel (!%p18_p12) target bundleno = 7 (0x7), region = 94 }
  0xb1   :  { %263 = vsyncpa [#allocation3], 1 }
  0xb2   :  { %265 = vsyncpa [#allocation3 + $0x1], 1 }
  0xb3   :  { %266 = vsyncpa [#allocation6], 1 }
  0xb4   :  { %268 = vsyncpa [#allocation6 + $0x1], 1 }
  0xb5   :  { %269 = vsyncpa [#allocation4], 1 }
  0xb6   :  { %271 = vsyncpa [#allocation4 + $0x1], 1 }

</bundles_post_ra>
